<compile_context>
chip_gen: v6e
topology: v6e:2x2x1
jax: 0.10.0
libtpu: 0.0.40
codegen_flags: <defaults>
</compile_context>

<pallas_src>
import functools

import jax
import jax.numpy as jnp
from jax.experimental import pallas as pl
from jax.experimental.pallas import tpu as pltpu


def _mhsa_attn_kernel(qpos_ref, kq_ref, v_ref, res_ref, o_ref,
                      m_scr, l_scr, acc_scr, *, n_valid, mask_keys):
    """One (batch, head, q-block) x kv-block step of the MHSA forward.

    Ref shapes (leading size-1 dims come from the BlockSpecs):
      qpos_ref: (1, 1, 2d, tq) bf16  [q ; rel_pos] at the query positions
      kq_ref  : (1, 1, 2d, tk) bf16  [k ; q]       at the key positions
      v_ref   : (1, 1, d,  tk) bf16  V             at the key positions
      res_ref : (1, 1, d,  tq)       residual (this head's x channels)
      o_ref   : (1, 1, d,  tq)       output
    Scratch:
      m_scr  : (1, tq) f32  running max   (online softmax)
      l_scr  : (1, tq) f32  running denom (online softmax)
      acc_scr: (d, tq) f32  running numerator of V @ attn^T
    """
    kj = pl.program_id(3)
    nk = pl.num_programs(3)

    @pl.when(kj == 0)
    def _init():
        m_scr[...] = jnp.full(m_scr.shape, -jnp.inf, m_scr.dtype)
        l_scr[...] = jnp.zeros(l_scr.shape, l_scr.dtype)
        acc_scr[...] = jnp.zeros(acc_scr.shape, acc_scr.dtype)

    kq = kq_ref[0, 0]                                   # (2d, tk) bf16
    lhs = qpos_ref[0, 0]                                # (2d, tq) bf16

    # energy^T block, (tk, tq): a single 2d-deep bf16 contraction fuses the
    # content-content (q^T k) and content-position (pos^T q) terms.
    e = jax.lax.dot_general(kq, lhs, (((0,), (0,)), ((), ())),
                            preferred_element_type=jnp.float32)

    if mask_keys:
        tk = e.shape[0]
        key_idx = kj * tk + jax.lax.broadcasted_iota(jnp.int32, (tk, 1), 0)
        e = jnp.where(key_idx < n_valid, e, -1e30)      # mask padded keys

    # Online softmax over the key axis (axis 0), per query column. f32 math
    # (portable to v5e); p is cast to bf16 only for the PV matmul.
    m_prev = m_scr[...]                                 # (1, tq)
    m_new = jnp.maximum(m_prev, jnp.max(e, axis=0, keepdims=True))
    alpha = jnp.exp(m_prev - m_new)
    p = jnp.exp(e - m_new)                              # (tk, tq) f32
    l_scr[...] = alpha * l_scr[...] + jnp.sum(p, axis=0, keepdims=True)
    acc_scr[...] = alpha * acc_scr[...] + jax.lax.dot_general(
        v_ref[0, 0], p.astype(jnp.bfloat16), (((1,), (0,)), ((), ())),
        preferred_element_type=jnp.float32)             # (d, tq)
    m_scr[...] = m_new

    @pl.when(kj == nk - 1)
    def _finalize():
        inv_l = pl.reciprocal(l_scr[...], approx=True)  # EUP
        out = acc_scr[...] * inv_l + res_ref[0, 0].astype(jnp.float32)
        o_ref[0, 0] = out.astype(o_ref.dtype)


def _pick_tiles(n_pad):
    """Role-aware tiles. n_pad is a multiple of 128.

    tq large (minimizes the number of full KV sweeps / kv re-streaming),
    tk moderate (256-multiple preferred for the 256-wide MXU on v6e/v7x).
    """
    def pick(cands):
        for t in cands:
            if n_pad % t == 0:
                return t
        return 128
    return pick((512, 256, 128)), pick((256, 128))


def mhsa_forward(x, params, head, *, tq=None, tk=None):
    """Pallas TPU forward for the MHSA module (NCHW input)."""
    B, C, W, H = x.shape
    N = W * H
    assert C % head == 0
    d = C // head

    n_pad = 128 * pl.cdiv(N, 128)
    need_mask = n_pad != N

    # ---- pre-projection: one big (3C, C) x (C, N) GEMM per batch (XLA) ----
    # Rows are stacked [K; Q; V]; bias is folded in here (no bias stream or
    # per-step broadcast-add inside the kernel).
    w3 = jnp.concatenate([params["wk"], params["wq"], params["wv"]], axis=0)
    b3 = jnp.concatenate([params["bk"], params["bq"], params["bv"]], axis=0)

    x_flat = x.reshape(B, C, N)
    if need_mask:
        x_flat = jnp.pad(x_flat, ((0, 0), (0, 0), (0, n_pad - N)))
    proj = jnp.einsum("oc,bcn->bon", w3, x_flat) + b3[None, :, None]  # f32
    k = proj[:, 0:C].reshape(B, head, d, n_pad)
    q = proj[:, C:2 * C].reshape(B, head, d, n_pad)
    v = proj[:, 2 * C:3 * C].reshape(B, head, d, n_pad)

    pos = (params["rel_h"] + params["rel_w"]).reshape(head, d, N)
    if need_mask:
        pos = jnp.pad(pos, ((0, 0), (0, 0), (0, n_pad - N)))
    pos_b = jnp.broadcast_to(pos[None], (B, head, d, n_pad))

    # bf16 operand streams: halves HBM->VMEM traffic and double-buffer VMEM;
    # the MXU inputs were bf16 already so numerics are unchanged.
    kq = jnp.concatenate([k, q], axis=2).astype(jnp.bfloat16)       # (B,h,2d,N)
    qpos = jnp.concatenate([q, pos_b], axis=2).astype(jnp.bfloat16)  # (B,h,2d,N)
    v_bf = v.astype(jnp.bfloat16)                                    # (B,h,d,N)
    res = x_flat.reshape(B, head, d, n_pad)                          # residual

    if tq is None or tk is None:
        tq0, tk0 = _pick_tiles(n_pad)
        tq = tq if tq is not None else tq0
        tk = tk if tk is not None else tk0
    assert n_pad % tq == 0 and n_pad % tk == 0
    nq, nk = n_pad // tq, n_pad // tk

    kernel = functools.partial(_mhsa_attn_kernel, n_valid=N, mask_keys=need_mask)

    out = pl.pallas_call(
        kernel,
        out_shape=jax.ShapeDtypeStruct((B, head, d, n_pad), x.dtype),
        grid_spec=pltpu.PrefetchScalarGridSpec(
            num_scalar_prefetch=0,
            grid=(B, head, nq, nk),
            in_specs=[
                # [q; pos] at query positions: resident across the kv axis.
                pl.BlockSpec((1, 1, 2 * d, tq), lambda b, h, qi, kj: (b, h, 0, qi)),
                # [k; q] at key positions: streamed along the kv axis.
                pl.BlockSpec((1, 1, 2 * d, tk), lambda b, h, qi, kj: (b, h, 0, kj)),
                # V at key positions: streamed along the kv axis.
                pl.BlockSpec((1, 1, d, tk), lambda b, h, qi, kj: (b, h, 0, kj)),
                # Residual slice at query positions: resident across kv axis.
                pl.BlockSpec((1, 1, d, tq), lambda b, h, qi, kj: (b, h, 0, qi)),
            ],
            out_specs=pl.BlockSpec((1, 1, d, tq),
                                   lambda b, h, qi, kj: (b, h, 0, qi)),
            scratch_shapes=[
                pltpu.VMEM((1, tq), jnp.float32),   # running max
                pltpu.VMEM((1, tq), jnp.float32),   # running denom
                pltpu.VMEM((d, tq), jnp.float32),   # output accumulator
            ],
        ),
        compiler_params=pltpu.CompilerParams(
            dimension_semantics=("parallel", "parallel", "parallel", "arbitrary")),
    )(qpos, kq, v_bf, res)

    if need_mask:
        out = out[..., :N]
    return out.reshape(B, C, W, H)


def mhsa_reference(x, params, head):
    """Pure-JAX reference that mirrors the PyTorch MHSA.forward()."""
    B, C, W, H = x.shape
    N = W * H
    d = C // head
    xf = x.reshape(B, C, N)

    def proj(w, b):
        y = jnp.einsum("oc,bcn->bon", w, xf, precision="highest")
        return (y + b[None, :, None]).reshape(B, head, d, N)

    q = proj(params["wq"], params["bq"])
    k = proj(params["wk"], params["bk"])
    v = proj(params["wv"], params["bv"])

    cc = jnp.einsum("bhdn,bhdm->bhnm", q, k, precision="highest")
    pos = (params["rel_h"] + params["rel_w"]).reshape(head, d, N)
    cp = jnp.einsum("hdn,bhdm->bhnm", pos, q, precision="highest")
    attn = jax.nn.softmax(cc + cp, axis=-1)
    out = jnp.einsum("bhdm,bhnm->bhdn", v, attn, precision="highest")
    # The register-token rows are packed along the head axis in the PyTorch
    # code and dropped again by `unpack`; they never mix with these rows.
    return out.reshape(B, C, W, H) + x


def _make_params(key, C, W, H, head, num_register_tokens=1):
    d = C // head
    ks = jax.random.split(key, 10)
    return {
        "wq": jax.random.normal(ks[0], (C, C), jnp.float32) * 0.1,
        "bq": jax.random.normal(ks[1], (C,), jnp.float32) * 0.1,
        "wk": jax.random.normal(ks[2], (C, C), jnp.float32) * 0.1,
        "bk": jax.random.normal(ks[3], (C,), jnp.float32) * 0.1,
        "wv": jax.random.normal(ks[4], (C, C), jnp.float32) * 0.1,
        "bv": jax.random.normal(ks[5], (C,), jnp.float32) * 0.1,
        "rel_h": jax.random.normal(ks[6], (1, head, d, 1, H), jnp.float32),
        "rel_w": jax.random.normal(ks[7], (1, head, d, W, 1), jnp.float32),
        # Present for module parity; dropped by `unpack` in the PyTorch
        # forward, so they have no effect on the output and are unused here.
        "register_tokens": jax.random.normal(
            ks[8], (num_register_tokens, W * H, W * H), jnp.float32),
        "register_tokens_v": jax.random.normal(
            ks[9], (num_register_tokens, d, W * H), jnp.float32),
    }


if __name__ == "__main__":
    key = jax.random.PRNGKey(0)
    k_main, k_p1, k_x1, k_p2, k_x2 = jax.random.split(key, 5)

    # --- test 1: N multiple of 128 (16x16 -> 256), multi q/kv blocks -------
    B, C, W, H, head = 2, 16, 16, 16, 2
    params1 = _make_params(k_p1, C, W, H, head)
    x1 = jax.random.normal(k_x1, (B, C, W, H), jnp.float32)

    out1 = jax.block_until_ready(mhsa_forward(x1, params1, head, tq=128, tk=128))
    ref1 = mhsa_reference(x1, params1, head)
    assert out1.shape == (B, C, W, H)
    err1 = jnp.max(jnp.abs(out1 - ref1))
    assert jnp.allclose(out1, ref1, rtol=5e-2, atol=5e-2), (
        f"mismatch vs reference, test 1 (max abs err {err1})")

    # --- test 2: N NOT a multiple of 128 (9x9 -> 81), padded + masked ------
    W2 = H2 = 9
    params2 = _make_params(k_p2, C, W2, H2, head)
    x2 = jax.random.normal(k_x2, (B, C, W2, H2), jnp.float32)

    out2 = jax.block_until_ready(mhsa_forward(x2, params2, head))
    ref2 = mhsa_reference(x2, params2, head)
    assert out2.shape == (B, C, W2, H2)
    err2 = jnp.max(jnp.abs(out2 - ref2))
    assert jnp.allclose(out2, ref2, rtol=5e-2, atol=5e-2), (
        f"mismatch vs reference, test 2 (max abs err {err2})")

    print("KERNEL_OK")
</pallas_src>

<mosaic_0001>
module attributes {stable_mosaic.version = 11 : i64} {
  func.func @_mhsa_attn_kernel(%arg0: i32, %arg1: i32, %arg2: i32, %arg3: i32, %arg4: memref<1x1x16x128xbf16, #tpu.memory_space<vmem>>, %arg5: memref<1x1x16x128xbf16, #tpu.memory_space<vmem>>, %arg6: memref<1x1x8x128xbf16, #tpu.memory_space<vmem>>, %arg7: memref<1x1x8x128xf32, #tpu.memory_space<vmem>>, %arg8: memref<1x1x8x128xf32, #tpu.memory_space<vmem>>, %arg9: memref<1x128xf32, #tpu.memory_space<vmem>>, %arg10: memref<1x128xf32, #tpu.memory_space<vmem>>, %arg11: memref<8x128xf32, #tpu.memory_space<vmem>>) attributes {dimension_semantics = [#tpu.dimension_semantics<parallel>, #tpu.dimension_semantics<parallel>, #tpu.dimension_semantics<parallel>, #tpu.dimension_semantics<arbitrary>], iteration_bounds = array<i64: 2, 2, 2, 2>, scalar_prefetch = 0 : i64, scratch_operands = 3 : i64, tpu.core_type = #tpu.core_type<tc>, window_params = [{transform_indices = @transform_0, window_bounds = array<i64: 1, 1, 16, 128>}, {transform_indices = @transform_1, window_bounds = array<i64: 1, 1, 16, 128>}, {transform_indices = @transform_2, window_bounds = array<i64: 1, 1, 8, 128>}, {transform_indices = @transform_3, window_bounds = array<i64: 1, 1, 8, 128>}, {transform_indices = @transform_4, window_bounds = array<i64: 1, 1, 8, 128>}]} {
    %c0_i32 = arith.constant 0 : i32
    %0 = arith.cmpi eq, %arg3, %c0_i32 : i32
    %1 = arith.extui %0 : i1 to i32
    %c0_i32_0 = arith.constant 0 : i32
    %2 = arith.cmpi ne, %1, %c0_i32_0 : i32
    scf.if %2 {
      %cst_28 = arith.constant 0xFF800000 : f32
      %36 = vector.broadcast %cst_28 : f32 to vector<1x128xf32>
      %c0_29 = arith.constant 0 : index
      %c0_30 = arith.constant 0 : index
      %37 = vector.load %arg9[%c0_29, %c0_30] : memref<1x128xf32, #tpu.memory_space<vmem>>, vector<1x128xf32>
      tpu.vector_store %arg9[%c0_29, %c0_30], %36 {strides = array<i32>} : memref<1x128xf32, #tpu.memory_space<vmem>>, vector<1x128xf32>,
      %cst_31 = arith.constant 0.000000e+00 : f32
      %38 = vector.broadcast %cst_31 : f32 to vector<1x128xf32>
      %c0_32 = arith.constant 0 : index
      %c0_33 = arith.constant 0 : index
      %39 = vector.load %arg10[%c0_32, %c0_33] : memref<1x128xf32, #tpu.memory_space<vmem>>, vector<1x128xf32>
      tpu.vector_store %arg10[%c0_32, %c0_33], %38 {strides = array<i32>} : memref<1x128xf32, #tpu.memory_space<vmem>>, vector<1x128xf32>,
      %cst_34 = arith.constant 0.000000e+00 : f32
      %40 = vector.broadcast %cst_34 : f32 to vector<8x128xf32>
      %c0_35 = arith.constant 0 : index
      %c0_36 = arith.constant 0 : index
      %41 = vector.load %arg11[%c0_35, %c0_36] : memref<8x128xf32, #tpu.memory_space<vmem>>, vector<8x128xf32>
      tpu.vector_store %arg11[%c0_35, %c0_36], %40 {strides = array<i32>} : memref<8x128xf32, #tpu.memory_space<vmem>>, vector<8x128xf32>,
    } else {
    }
    %c0 = arith.constant 0 : index
    %c0_1 = arith.constant 0 : index
    %c0_2 = arith.constant 0 : index
    %c0_3 = arith.constant 0 : index
    %3 = vector.load %arg5[%c0, %c0_1, %c0_2, %c0_3] : memref<1x1x16x128xbf16, #tpu.memory_space<vmem>>, vector<1x1x16x128xbf16>
    %4 = vector.shape_cast %3 : vector<1x1x16x128xbf16> to vector<16x128xbf16>
    %c0_4 = arith.constant 0 : index
    %c0_5 = arith.constant 0 : index
    %c0_6 = arith.constant 0 : index
    %c0_7 = arith.constant 0 : index
    %5 = vector.load %arg4[%c0_4, %c0_5, %c0_6, %c0_7] : memref<1x1x16x128xbf16, #tpu.memory_space<vmem>>, vector<1x1x16x128xbf16>
    %6 = vector.shape_cast %5 : vector<1x1x16x128xbf16> to vector<16x128xbf16>
    %cst = arith.constant dense<0.000000e+00> : vector<128x128xf32>
    %7 = tpu.matmul %4, %6, %cst {dimension_numbers = #tpu.dot_dimension_numbers<[0], [0], [1], [1], [0, 1, 1, 1], [], []>} : vector<16x128xbf16>, vector<16x128xbf16>, vector<128x128xf32> -> vector<128x128xf32>
    %c0_8 = arith.constant 0 : index
    %c0_9 = arith.constant 0 : index
    %8 = vector.load %arg9[%c0_8, %c0_9] : memref<1x128xf32, #tpu.memory_space<vmem>>, vector<1x128xf32>
    %cst_10 = arith.constant dense<0xFF800000> : vector<128xf32>
    %9 = vector.multi_reduction <maximumf>, %7, %cst_10 [0] : vector<128x128xf32> to vector<128xf32>
    %10 = vector.shape_cast %9 : vector<128xf32> to vector<1x128xf32>
    %11 = arith.maximumf %8, %10 : vector<1x128xf32>
    %12 = arith.subf %8, %11 : vector<1x128xf32>
    %13 = math.exp %12 : vector<1x128xf32>
    %14 = vector.broadcast %11 : vector<1x128xf32> to vector<128x128xf32>
    %15 = arith.subf %7, %14 : vector<128x128xf32>
    %16 = math.exp %15 : vector<128x128xf32>
    %c0_11 = arith.constant 0 : index
    %c0_12 = arith.constant 0 : index
    %17 = vector.load %arg10[%c0_11, %c0_12] : memref<1x128xf32, #tpu.memory_space<vmem>>, vector<1x128xf32>
    %18 = arith.mulf %13, %17 : vector<1x128xf32>
    %cst_13 = arith.constant dense<0.000000e+00> : vector<128xf32>
    %19 = vector.multi_reduction <add>, %16, %cst_13 [0] : vector<128x128xf32> to vector<128xf32>
    %20 = vector.shape_cast %19 : vector<128xf32> to vector<1x128xf32>
    %21 = arith.addf %18, %20 : vector<1x128xf32>
    %c0_14 = arith.constant 0 : index
    %c0_15 = arith.constant 0 : index
    %22 = vector.load %arg10[%c0_14, %c0_15] : memref<1x128xf32, #tpu.memory_space<vmem>>, vector<1x128xf32>
    tpu.vector_store %arg10[%c0_14, %c0_15], %21 {strides = array<i32>} : memref<1x128xf32, #tpu.memory_space<vmem>>, vector<1x128xf32>,
    %c0_16 = arith.constant 0 : index
    %c0_17 = arith.constant 0 : index
    %23 = vector.load %arg11[%c0_16, %c0_17] : memref<8x128xf32, #tpu.memory_space<vmem>>, vector<8x128xf32>
    %24 = vector.broadcast %13 : vector<1x128xf32> to vector<8x128xf32>
    %25 = arith.mulf %24, %23 : vector<8x128xf32>
    %c0_18 = arith.constant 0 : index
    %c0_19 = arith.constant 0 : index
    %c0_20 = arith.constant 0 : index
    %c0_21 = arith.constant 0 : index
    %26 = vector.load %arg6[%c0_18, %c0_19, %c0_20, %c0_21] : memref<1x1x8x128xbf16, #tpu.memory_space<vmem>>, vector<1x1x8x128xbf16>
    %27 = vector.shape_cast %26 : vector<1x1x8x128xbf16> to vector<8x128xbf16>
    %28 = arith.truncf %16 : vector<128x128xf32> to vector<128x128xbf16>
    %cst_22 = arith.constant dense<0.000000e+00> : vector<8x128xf32>
    %29 = tpu.matmul %27, %28, %cst_22 {dimension_numbers = #tpu.dot_dimension_numbers<[1], [0], [0], [1], [0, 0, 1, 1], [], []>} : vector<8x128xbf16>, vector<128x128xbf16>, vector<8x128xf32> -> vector<8x128xf32>
    %30 = arith.addf %25, %29 : vector<8x128xf32>
    %c0_23 = arith.constant 0 : index
    %c0_24 = arith.constant 0 : index
    %31 = vector.load %arg11[%c0_23, %c0_24] : memref<8x128xf32, #tpu.memory_space<vmem>>, vector<8x128xf32>
    tpu.vector_store %arg11[%c0_23, %c0_24], %30 {strides = array<i32>} : memref<8x128xf32, #tpu.memory_space<vmem>>, vector<8x128xf32>,
    %c0_25 = arith.constant 0 : index
    %c0_26 = arith.constant 0 : index
    %32 = vector.load %arg9[%c0_25, %c0_26] : memref<1x128xf32, #tpu.memory_space<vmem>>, vector<1x128xf32>
    tpu.vector_store %arg9[%c0_25, %c0_26], %11 {strides = array<i32>} : memref<1x128xf32, #tpu.memory_space<vmem>>, vector<1x128xf32>,
    %c1_i32 = arith.constant 1 : i32
    %33 = arith.cmpi eq, %arg3, %c1_i32 : i32
    %34 = arith.extui %33 : i1 to i32
    %c0_i32_27 = arith.constant 0 : i32
    %35 = arith.cmpi ne, %34, %c0_i32_27 : i32
    scf.if %35 {
      %c0_28 = arith.constant 0 : index
      %c0_29 = arith.constant 0 : index
      %36 = vector.load %arg10[%c0_28, %c0_29] : memref<1x128xf32, #tpu.memory_space<vmem>>, vector<1x128xf32>
      %37 = tpu.reciprocal %36 {approx = true} : vector<1x128xf32> -> vector<1x128xf32>
      %c0_30 = arith.constant 0 : index
      %c0_31 = arith.constant 0 : index
      %38 = vector.load %arg11[%c0_30, %c0_31] : memref<8x128xf32, #tpu.memory_space<vmem>>, vector<8x128xf32>
      %39 = vector.broadcast %37 : vector<1x128xf32> to vector<8x128xf32>
      %40 = arith.mulf %38, %39 : vector<8x128xf32>
      %c0_32 = arith.constant 0 : index
      %c0_33 = arith.constant 0 : index
      %c0_34 = arith.constant 0 : index
      %c0_35 = arith.constant 0 : index
      %41 = vector.load %arg7[%c0_32, %c0_33, %c0_34, %c0_35] : memref<1x1x8x128xf32, #tpu.memory_space<vmem>>, vector<1x1x8x128xf32>
      %42 = vector.shape_cast %41 : vector<1x1x8x128xf32> to vector<8x128xf32>
      %43 = arith.addf %40, %42 : vector<8x128xf32>
      %c0_36 = arith.constant 0 : index
      %c0_37 = arith.constant 0 : index
      %c0_38 = arith.constant 0 : index
      %c0_39 = arith.constant 0 : index
      %44 = vector.load %arg8[%c0_36, %c0_37, %c0_38, %c0_39] : memref<1x1x8x128xf32, #tpu.memory_space<vmem>>, vector<1x1x8x128xf32>
      %45 = vector.shape_cast %44 : vector<1x1x8x128xf32> to vector<8x128xf32>
      %46 = vector.shape_cast %43 : vector<8x128xf32> to vector<1x1x8x128xf32>
      tpu.vector_store %arg8[%c0_36, %c0_37, %c0_38, %c0_39], %46 {strides = array<i32>} : memref<1x1x8x128xf32, #tpu.memory_space<vmem>>, vector<1x1x8x128xf32>,
    } else {
    }
    return
  }
  func.func @transform_0(%arg0: i32, %arg1: i32, %arg2: i32, %arg3: i32) -> (i32, i32, i32, i32) {
    %c0_i32 = arith.constant 0 : i32
    %c0_i32_0 = arith.constant 0 : i32
    return %arg0, %arg1, %c0_i32, %arg2 : i32, i32, i32, i32
  }
  func.func @transform_1(%arg0: i32, %arg1: i32, %arg2: i32, %arg3: i32) -> (i32, i32, i32, i32) {
    %c0_i32 = arith.constant 0 : i32
    %c0_i32_0 = arith.constant 0 : i32
    return %arg0, %arg1, %c0_i32, %arg3 : i32, i32, i32, i32
  }
  func.func @transform_2(%arg0: i32, %arg1: i32, %arg2: i32, %arg3: i32) -> (i32, i32, i32, i32) {
    %c0_i32 = arith.constant 0 : i32
    %c0_i32_0 = arith.constant 0 : i32
    return %arg0, %arg1, %c0_i32, %arg3 : i32, i32, i32, i32
  }
  func.func @transform_3(%arg0: i32, %arg1: i32, %arg2: i32, %arg3: i32) -> (i32, i32, i32, i32) {
    %c0_i32 = arith.constant 0 : i32
    %c0_i32_0 = arith.constant 0 : i32
    return %arg0, %arg1, %c0_i32, %arg2 : i32, i32, i32, i32
  }
  func.func @transform_4(%arg0: i32, %arg1: i32, %arg2: i32, %arg3: i32) -> (i32, i32, i32, i32) {
    %c0_i32 = arith.constant 0 : i32
    %c0_i32_0 = arith.constant 0 : i32
    return %arg0, %arg1, %c0_i32, %arg2 : i32, i32, i32, i32
  }
}

</mosaic_0001>

<bundles_post_ra>
// kernel: tpu_custom_call.1
= control target key start
LH: loop header
LB: loop body
LE: loop exit
PB: predicated region body
PF: predicated region fallthrough
CT: control target
= control target key end

     0   :  { %s2008_s0 = inlined_call_operand.hbm [shape: bf16[2,2,16,256], index: 0, kind: input, shape index: {}]   ;;  %s2009_s1 = inlined_call_operand.hbm [shape: bf16[2,2,16,256], index: 1, kind: input, shape index: {}]   ;;  %s2010_s2 = inlined_call_operand.hbm [shape: bf16[2,2,8,256], index: 2, kind: input, shape index: {}]   ;;  %s2011_s3 = inlined_call_operand.hbm [shape: f32[2,2,8,256], index: 3, kind: input, shape index: {}]   ;;  %s2012_s4 = inlined_call_operand.hbm [shape: f32[2,2,8,256], index: 4, kind: output, shape index: {}]  }
   0x1   :  { %2040 = sst [smem:[#allocation37_spill]] %s2008_s0 }
   0x2   :  { %2041 = sst [smem:[#allocation38_spill]] %s2009_s1 }
   0x3   :  { %2042 = sst [smem:[#allocation39_spill]] %s2011_s3 }
   0x4   :  { %2043 = sst [smem:[#allocation40_spill]] %s2012_s4 }
   0x5   :  { %9 = vsyncpa [#allocation6], 0 }
   0x6   :  { %11 = vsyncpa [#allocation6 + $0x1], 0 }
   0x7   :  { %12 = vsyncpa [#allocation9], 0 }
   0x8   :  { %14 = vsyncpa [#allocation9 + $0x1], 0 }
   0x9   :  { %15 = vsyncpa [#allocation12], 0 }
   0xa   :  { %17 = vsyncpa [#allocation12 + $0x1], 0 }
   0xb   :  { %18 = vsyncpa [#allocation7], 0 }
   0xc   :  { %20 = vsyncpa [#allocation7 + $0x1], 0  ;;  %s1534_s15 = smov 0   ;;  %s1536_s16 = smov 0  }
   0xd   :  { %s1538_s17 = smov 0   ;;  %s1540_s18 = smov 0  }
   0xe   :  { %s1542_s19 = smov 0   ;;  %s1544_s20 = smov 0  }
   0xf   :  { %s1546_s21 = smov 0   ;;  %s1548_s22 = smov 0  }
  0x10   :  { %s1550_s23 = smov 0   ;;  %s1552_s24 = smov 0  }
  0x11   :  { %s1554_s25 = smov 0   ;;  %s1556_s26 = smov 0  }
  0x12   :  { %s1558_s27 = smov 0   ;;  %s1560_s28 = smov 0  }
  0x13   :  { %s1562_s29 = smov 0  }
  0x14 LB: > { %2044 = sst [smem:[#allocation18_spill]] %s1443_s16  ;;  %s1608_s30 = sadd.s32 4294967295, %s1495_s29   ;;  %s1495_s29 = sphi %s1562_s29, %s26_s29   ;;  %s1491_s28 = sphi %s1560_s28, %s2129_s28   ;;  %s1487_s27 = sphi %s1558_s27, %s2128_s27   ;;  %s1483_s26 = sphi %s1556_s26, %s2116_s26   ;;  %s1479_s25 = sphi %s1554_s25, %s2127_s25   ;;  %s1475_s24 = sphi %s1552_s24, %s2126_s24   ;;  %s1471_s23 = sphi %s1550_s23, %s2125_s23   ;;  %s1467_s22 = sphi %s1548_s22, %s2114_s22   ;;  %s1463_s21 = sphi %s1546_s21, %s2124_s21   ;;  %s1459_s20 = sphi %s1544_s20, %s2123_s20   ;;  %s1455_s19 = sphi %s1542_s19, %s2122_s19   ;;  %s1451_s18 = sphi %s1540_s18, %s2112_s18   ;;  %s1447_s17 = sphi %s1538_s17, %s2121_s17   ;;  %s1443_s16 = sphi %s1536_s16, %s2120_s16   ;;  %s1439_s15 = sphi %s1534_s15, %s2111_s15  }
  0x15   : > { %2045 = sst [smem:[#allocation19_spill]] %s1451_s18  ;;  %s41_s5 = sadd.s32 1, %s1479_s25 }
  0x16   : > { %2046 = sst [smem:[#allocation20_spill]] %s1455_s19  ;;  %p1611_p0 = scmp.ge.s32.totalorder %s41_s5, 2 }
  0x17   : > { %2047 = sst [smem:[#allocation21_spill]] %s1463_s21  ;;  %p71_p1 = scmp.eq.s32.totalorder %s1495_s29, 0 }
  0x18   : > { %2048 = sst [smem:[#allocation22_spill]] %s1467_s22  ;;  %s2131_s5 = smov (%p1611_p0, %s41_s5), 0 }
  0x19   : > { %2049 = sst [smem:[#allocation23_spill]] %s1471_s23  ;;  %p2019_p2 = scmp.eq.s32.totalorder %s1608_s30, 0 }
  0x1a   : > { %2050 = sst [smem:[#allocation24_spill]] %s1475_s24  ;;  %p100_p3 = scmp.ne.s32.totalorder %s1447_s17, %s1443_s16 }
  0x1b   : > { %2051 = sst [smem:[#allocation25_spill]] %s1483_s26  ;;  %p106_p4 = scmp.ne.s32.totalorder %s1443_s16, %s1439_s15 }
  0x1c   : > { %2052 = sst [smem:[#allocation26_spill]] %s1608_s30  ;;  %p1631_p5 = por %p100_p3, %p71_p1 }
  0x1d   : > { %2054 = sst [smem:[#allocation27_spill]] %s2131_s5  ;;  %p2018_p6 = scmp.lt.s32.totalorder %s1495_s29, 16 }
  0x1e   : > { %p1638_p7 = por %p106_p4, %p2019_p2  ;;  %s933_s13 = sshll.u32 %s1487_s27, 2 }
  0x1f   : > { %s2023_s14 = sshll.u32 %s1491_s28, 3  ;;  %s244_s9 = sand.u32 1, %s1495_s29  }
  0x20   : > { %s2056_s12 = scalar_select %p1638_p7, 1, 0 }
  0x21   : > { %s2017_s10 = sand.u32 1, %s1447_s17   ;;  %s253_s8 = sadd.s32 %s1479_s25, %s933_s13 }
  0x22   : > { %2057 = sst [smem:[#allocation28_spill]] %s2056_s12  ;;  %s936_s15 = sshll.u32 %s2017_s10, 3 }
  0x23   : > { %s255_s7 = sadd.s32 %s2023_s14, %s253_s8  ;;  %s248_s4 = scalar_lea.vmem [#allocation8], %s936_s15 }
  0x24   : > { %s258_s24 = sshll.u32 %s248_s4, 4  ;;  %s939_s22 = sshll.u32 %s255_s7, 6  ;;  %s259_s24 = int_to_ptr.vmem [resolvable:$true] %s258_s24 }
  0x25   : > { %s2058_s1 = sld [smem:[#allocation38_spill]]  ;;  %p1660_p8 = pnand %p2018_p6, %p1631_p5 }
  0x26   : > { %p948_p9 = scmp.ge.s32.totalorder %s1495_s29, 1  ;;  %p310_p10 = scmp.lt.s32.totalorder %s1495_s29, 17 }
  0x27   : > { %s1666_s10 = scalar_lea.sflag [#allocation9], %s244_s9  ;;  %p2036_p11 = pneg %p1660_p8 }
  0x28   : > { %s1236_s4 = scalar_lea.vmem %s259_s24, 128  ;;  %s1497_s21 = smov [#allocation8]  }
  0x29   : > { %p1237_p12 = scmp.ne.s32.totalorder %s259_s24, %s1236_s4 }
  0x2b   : > { %s257_s16 = scalar_lea.hbm %s2058_s1, %s939_s22  ;;  %p1239_p13 = pnand %p1237_p12, %p2036_p11 }
  0x2c   : > { %s1241_s22 = sshll.u32 %s1497_s21, 4  ;;  %s1242_s22 = int_to_ptr.vmem [resolvable:$false] %s1241_s22 }
  0x2d   : > { %p1240_p3 = pneg %p1239_p13  ;;  %s1243_s23 = scalar_lea.vmem %s1242_s22, 256 }
  0x2e   : > { %p1244_p4 = scmp.lt.s32.totalorder %s259_s24, %s1242_s22  ;;  %p1245_p5 = scmp.lt.s32.totalorder %s1243_s23, %s1236_s4 }
  0x30   : > { %p1246_p6 = por %p1245_p5, %p1244_p4 }
  0x32   : > { %p1247_p2 = pnand %p1246_p6, %p1240_p3 }
  0x34   : > { %1250 = shalt.err (!%p1247_p2)
}
  0x35   : > { %s2020_s7 = smov 128   ;;  %s2021_s8 = smov 64  }
  0x36   : > { %s2022_s9 = smov 4   ;;  %p1683_p2 = pnand %p948_p9, %p310_p10 }
  0x37   : > { %1044 = dma.hbm_to_vmem [thread:$0]  (!%p1660_p8), %s257_s16, 128, %s259_s24, %s1666_s10, %s2020_s7, %s2021_s8, %s2022_s9  }
  0x38   : > { %s2060_s11 = scalar_select %p1683_p2, 1, 0 }
  0x39   : > { %s929_s15 = sadd.s32 4294967294, %s1495_s29   ;;  %s44_s4 = sadd.s32 1, %s1483_s26 }
  0x3a   : > { %2061 = sst [smem:[#allocation29_spill]] %s2060_s11  ;;  %s2133_s4 = smov (!%p1611_p0, %s44_s4), %s1483_s26 }
  0x3b   : > { %p70_p6 = scmp.ne.s32.totalorder %s1459_s20, %s1455_s19  ;;  %p46_p12 = scmp.ge.s32.totalorder %s2133_s4, 2 }
  0x3c   : > { %p76_p13 = scmp.ne.s32.totalorder %s1455_s19, %s1451_s18  ;;  %p194_p9 = scmp.eq.s32.totalorder %s1608_s30, 15 }
  0x3d   : > { %p1699_p3 = por %p71_p1, %p70_p6  ;;  %s2135_s4 = smov (%p46_p12, %s2133_s4), 0 }
  0x3e   : > { %2063 = sst [smem:[#allocation30_spill]] %s2135_s4  ;;  %s2064_s24 = sadd.s32 1, %s1487_s27 }
  0x3f   : > { %s2137_s24 = smov (!%p46_p12, %s2064_s24), %s1487_s27  ;;  %s59_s6 = ssub.s32 %s1483_s26, %s2135_s4 }
  0x40   : > { %p2065_p0 = scmp.eq.s32.totalorder %s1608_s30, 0  ;;  %p50_p1 = scmp.ge.s32.totalorder %s2137_s24, 2 }
  0x41   : > { %p1720_p4 = por %p194_p9, %p70_p6  ;;  %p200_p5 = scmp.eq.s32.totalorder %s929_s15, 15 }
  0x42   : > { %p1716_p10 = por %p2065_p0, %p76_p13  ;;  %s1725_s7 = sand.u32 1, %s1459_s20  }
  0x43   : > { %s2068_s23 = scalar_select %p1720_p4, 1, 0 }
  0x44   : > { %s2066_s22 = scalar_select %p1716_p10, 1, 0 }
  0x45   : > { %2069 = sst [smem:[#allocation32_spill]] %s2068_s23  ;;  %s2139_s24 = smov (%p50_p1, %s2137_s24), 0 }
  0x46   : > { %2067 = sst [smem:[#allocation31_spill]] %s2066_s22  ;;  %s2071_s8 = sadd.s32 1, %s1491_s28 }
  0x47   : > { %2070 = sst [smem:[#allocation33_spill]] %s2139_s24  ;;  %s2141_s8 = smov (!%p50_p1, %s2071_s8), %s1491_s28 }
  0x48   : > { %s57_s9 = ssub.s32 %s1487_s27, %s2139_s24  ;;  %p1737_p12 = por %p200_p5, %p76_p13 }
  0x49   : > { %p54_p6 = scmp.ge.s32.totalorder %s2141_s8, 2  ;;  %s229_s14 = sadd.s32 %s1483_s26, %s933_s13 }
  0x4a   : > { %s2072_s21 = scalar_select %p1737_p12, 1, 0 }
  0x4b   : > { %s2143_s8 = smov (%p54_p6, %s2141_s8), 0  ;;  %s2075_s1 = sshll.u32 %s1491_s28, 3 }
  0x4c   : > { %2073 = sst [smem:[#allocation34_spill]] %s2072_s21  ;;  %s231_s24 = sadd.s32 %s2075_s1, %s229_s14 }
  0x4d   : > { %2074 = sst [smem:[#allocation35_spill]] %s2143_s8  ;;  %s56_s4 = ssub.s32 %s1491_s28, %s2143_s8 }
  0x4e   : > { %s935_s18 = sshll.u32 %s231_s24, 6  ;;  %s58_s23 = sor.u32 %s57_s9, %s56_s4 }
  0x4f   : > { %s2076_s0 = sld [smem:[#allocation37_spill]]  ;;  %s60_s19 = sor.u32 %s59_s6, %s58_s23 }
  0x50   : > { %s2077_s15 = ssub.s32 %s1479_s25, %s2131_s5  ;;  %p61_p13 = scmp.eq.s32.totalorder %s60_s19, 0 }
  0x51   : > { %s90_s11 = sor.u32 %s2077_s15, %s58_s23  ;;  %s2078_s13 = sshll.u32 %s1725_s7, 3 }
  0x52   : > { %p91_p9 = scmp.eq.s32.totalorder %s90_s11, 0  ;;  %s224_s3 = scalar_lea.vmem [#allocation5], %s2078_s13 }
  0x53   : > { %s234_s26 = sshll.u32 %s224_s3, 4  ;;  %p2079_p0 = scmp.lt.s32.totalorder %s1495_s29, 16  ;;  %s235_s26 = int_to_ptr.vmem [resolvable:$true] %s234_s26 }
  0x54   : > { %s2081_s14 = sadd.s32 1, %s1459_s20  ;;  %s221_s19 = scalar_lea.sflag [#allocation6], %s1725_s7 }
  0x55   : > { %s1754_s22 = scalar_lea.hbm %s2076_s0, %s935_s18  ;;  %p1765_p1 = pnand %p2079_p0, %p1699_p3 }
  0x56   : > { %s1772_s30 = scalar_select %p61_p13, %s1459_s20, %s2081_s14  }
  0x57   : > { %s2083_s18 = sadd.s32 1, %s1447_s17  ;;  %p1253_p5 = pneg %p1765_p1 }
  0x58   : > { %2082 = sst [smem:[#allocation36_spill]] %s1772_s30  ;;  %s1264_s11 = scalar_lea.vmem %s235_s26, 128 }
  0x59   : > { %s1777_s9 = scalar_select %p91_p9, %s1447_s17, %s2083_s18  }
  0x5a   : > { %p1265_p6 = scmp.ne.s32.totalorder %s235_s26, %s1264_s11  ;;  %s1501_s3 = smov [#allocation5]  }
  0x5b   : > { %s1269_s4 = sshll.u32 %s1501_s3, 4  ;;  %s1270_s4 = int_to_ptr.vmem [resolvable:$false] %s1269_s4 }
  0x5c   : > { %p1267_p3 = pnand %p1265_p6, %p1253_p5  ;;  %s1271_s21 = scalar_lea.vmem %s1270_s4, 256 }
  0x5d   : > { %p1272_p11 = scmp.lt.s32.totalorder %s235_s26, %s1270_s4  ;;  %p1273_p13 = scmp.lt.s32.totalorder %s1271_s21, %s1264_s11 }
  0x5e   : > { %p1268_p0 = pneg %p1267_p3 }
  0x5f   : > { %p1274_p12 = por %p1273_p13, %p1272_p11 }
  0x61   : > { %p1275_p4 = pnand %p1274_p12, %p1268_p0 }
  0x63   : > { %1278 = shalt.err (!%p1275_p4)
}
  0x64   : > { %s2084_s16 = smov 4   ;;  %s2085_s24 = smov 64  }
  0x65   : > { %s2086_s6 = smov 128   ;;  %s2087_s23 = sand.u32 1, %s1447_s17  }
  0x66   : > { %1041 = dma.hbm_to_vmem [thread:$0]  (!%p1765_p1), %s1754_s22, 128, %s235_s26, %s221_s19, %s2086_s6, %s2085_s24, %s2084_s16  }
  0x67   : > { %s940_s15 = sshll.u32 %s2087_s23, 2  ;;  %s941_s13 = sshll.u32 %s1487_s27, 1 }
  0x68   : > { %s277_s14 = sadd.s32 %s1479_s25, %s941_s13  ;;  %s942_s18 = sshll.u32 %s1491_s28, 2 }
  0x69   : > { %s272_s11 = scalar_lea.vmem [#allocation10], %s940_s15  ;;  %s279_s4 = sadd.s32 %s942_s18, %s277_s14 }
  0x6a   : > { %s283_s3 = sshll.u32 %s272_s11, 4  ;;  %s943_s21 = sshll.u32 %s279_s4, 6  ;;  %s284_s3 = int_to_ptr.vmem [resolvable:$true] %s283_s3 }
  0x6b   : > { %s281_s5 = scalar_lea.hbm %s2010_s2, %s943_s21  ;;  %s1292_s30 = scalar_lea.vmem %s284_s3, 64 }
  0x6c   : > { %p1293_p11 = scmp.ne.s32.totalorder %s284_s3, %s1292_s30  ;;  %p2088_p4 = pneg %p1660_p8 }
  0x6d   : > { %s1502_s26 = smov [#allocation10]  }
  0x6e   : > { %p1295_p12 = pnand %p1293_p11, %p2088_p4  ;;  %s1297_s22 = sshll.u32 %s1502_s26, 4  ;;  %s1298_s22 = int_to_ptr.vmem [resolvable:$false] %s1297_s22 }
  0x6f   : > { %s1299_s19 = scalar_lea.vmem %s1298_s22, 128  ;;  %p1300_p6 = scmp.lt.s32.totalorder %s284_s3, %s1298_s22 }
  0x70   : > { %p1296_p9 = pneg %p1295_p12  ;;  %p1301_p3 = scmp.lt.s32.totalorder %s1299_s19, %s1292_s30 }
  0x72   : > { %p1302_p0 = por %p1301_p3, %p1300_p6 }
  0x74   : > { %p1303_p13 = pnand %p1302_p0, %p1296_p9 }
  0x76   : > { %1306 = shalt.err (!%p1303_p13)
}
  0x77   : > { %s2089_s0 = sld [smem:[#allocation25_spill]]  ;;  %s2090_s16 = sshll.u32 %s1725_s7, 3 }
  0x78   : > { %1047 = dma.hbm_to_vmem [thread:$0]  (!%p1660_p8), %s281_s5, 64, %s284_s3, %s1666_s10  }
  0x79   : > { %s294_s24 = scalar_lea.vmem [#allocation11], %s2090_s16  ;;  %s2091_s11 = sld [smem:[#allocation39_spill]] }
  0x7a   : > { %s305_s6 = sshll.u32 %s294_s24, 4  ;;  %s291_s21 = scalar_lea.sflag [#allocation12], %s1725_s7  ;;  %s306_s6 = int_to_ptr.vmem [resolvable:$true] %s305_s6 }
  0x7b   : > { %s1320_s26 = scalar_lea.vmem %s306_s6, 128  ;;  %s1503_s12 = smov [#allocation11]  }
  0x7c   : > { %p1321_p11 = scmp.ne.s32.totalorder %s306_s6, %s1320_s26  ;;  %s1325_s5 = sshll.u32 %s1503_s12, 4  ;;  %s1326_s5 = int_to_ptr.vmem [resolvable:$false] %s1325_s5 }
  0x7d   : > { %s299_s8 = sadd.s32 %s2089_s0, %s941_s13  ;;  %s1327_s10 = scalar_lea.vmem %s1326_s5, 256 }
  0x7e   : > { %s301_s23 = sadd.s32 %s942_s18, %s299_s8  ;;  %p1323_p4 = pnand %p1321_p11, %p1253_p5 }
  0x7f   : > { %s947_s15 = sshll.u32 %s301_s23, 7  ;;  %p1328_p8 = scmp.lt.s32.totalorder %s306_s6, %s1326_s5 }
  0x80   : > { %s303_s4 = scalar_lea.hbm %s2091_s11, %s947_s15  ;;  %p1324_p12 = pneg %p1323_p4 }
  0x81   : > { %p1329_p9 = scmp.lt.s32.totalorder %s1327_s10, %s1320_s26 }
  0x83   : > { %p1330_p6 = por %p1329_p9, %p1328_p8 }
  0x85   : > { %p1331_p3 = pnand %p1330_p6, %p1324_p12 }
  0x87   : > { %1334 = shalt.err (!%p1331_p3)
}
  0x88   : > { %1050 = dma.hbm_to_vmem [thread:$0]  (!%p1765_p1), %s303_s4, 128, %s306_s6, %s291_s21  }
  0x89   : > { %314 = sbr.rel (%p1683_p2) target bundleno = 838 (0x346), region = 36  ;;  %s2093_s7 = sld [smem:[#allocation20_spill]] (!%p1683_p2) }
  0x8f   : > { %s1820_s3 = sand.u32 1, %s2093_s7  }
  0x90   : > { %s1823_s22 = sshll.u32 %s1820_s3, 3  ;;  %s317_s19 = scalar_lea.sflag [#allocation6], %s1820_s3 }
  0x91   : > { %s320_s0 = scalar_lea.vmem [#allocation5], %s1823_s22 }
  0x92   : > { %1422 = dma.done.wait (%p1716_p10), %s317_s19, 128  }
  0x93   : > { %1424 = vsyncadd (%p1716_p10), %s317_s19, 4294967168  ;;  %s2095_s1 = sld [smem:[#allocation26_spill]] }
  0x94   : > { %s2096_s8 = sld [smem:[#allocation18_spill]] }
  0x99   : > { %s325_s24 = sand.u32 1, %s2095_s1  }
  0x9a   : > { %s327_s6 = sand.u32 1, %s2096_s8   ;;  %s326_s15 = scalar_lea.sflag [#allocation9], %s325_s24 }
  0x9b   : > { %s950_s23 = sshll.u32 %s327_s6, 3 }
  0x9c   : > { %s329_s14 = scalar_lea.vmem [#allocation8], %s950_s23 }
  0x9d   : > { %1426 = dma.done.wait (%p1638_p7), %s326_s15, 192  }
  0x9e   : > { %1428 = vsyncadd (%p1638_p7), %s326_s15, 4294967104  ;;  %s1837_s30 = sshll.u32 %s327_s6, 2  ;;  %s344_s4 = scalar_lea.sflag [#allocation12], %s1820_s3 }
  0x9f   : > { %s338_s11 = scalar_lea.vmem [#allocation10], %s1837_s30  ;;  %s347_s21 = scalar_lea.vmem [#allocation11], %s1823_s22 }
  0xa0   : > { %1430 = dma.done.wait (%p1716_p10), %s344_s4, 128  }
  0xa1   : > { %1432 = vsyncadd (%p1716_p10), %s344_s4, 4294967168  ;;  %s386_s26 = scalar_lea.vmem [#allocation13], %s1823_s22  ;;  %s2098_s12 = sld [smem:[#allocation21_spill]] }
  0xa7   : > { %p954_p2 = scmp.ne.s32.totalorder %s2098_s12, 0 }
  0xa9   : > { %391 = sbr.rel (%p954_p2) target bundleno = 177 (0xb1), region = 56 }
  0xae   : > { %v1504_v0 = vmov -inf   ;;  %v1505_v1 = vmov 0.0  }
  0xaf   : > { %392 = vst [vmem:[#allocation2] sm:$0x1] %v1504_v0  ;;  %393 = vst [vmem:[#allocation3] sm:$0x1] %v1505_v1 }
  0xb0   : > { %394 = vst [vmem:[#allocation4] sm:$0xff] %v1505_v1 }
  0xb1 PF: > { %v1185_v2 = vld [vmem:[%s329_s14] sm:$0xff]   ;;  %v1186_v3 = vld [vmem:[%s320_s0] sm:$0xff]   ;;  %vm427_vm0 = vcmask 130048   ;;  %v1506_v12 = vmov 0.0   ;;  %vm1507_vm1 = vmmov 0   ;;  %v576_v46 = vlaneseq  ;;  %s2099_s5 = sld [smem:[#allocation21_spill]] }
  0xb2   : > { %405 = vxpose.xlu0.c.b16.start.end [1/1] (short) %v1185_v2, 128  ;;  %990 = vmatprep.subr.bf16.mxu0 %v1186_v3 }
  0xb3   : > { %991 = vmatpush3.bf16.msra.mxu0 %v1186_v3  ;;  %1008 = vmatprep.subr.bf16.mxu1 %v1506_v12  ;;  %v577_v49 = vshrl.u32 %v576_v46, 7 }
  0xb4   : > { %1024 = vmatprep.mubr.msk.bf16.mxu1 %vm1507_vm1, %v1506_v12 }
  0xb5   : > { %v1888_v53 = vsub.s32 0, %v577_v49 }
  0xb6   : > { %v549_v51 = vld [vmem:[#allocation2] sm:$0x1] }
  0xb7   : > { %p965_p7 = scmp.ne.s32.totalorder %s2099_s5, 1 }
 0x114   : > { %v413_v4 = vpop.trf.xlu0 }
 0x115   : > { %992 = vmatprep.mubr.msk.bf16.mxu0 %vm427_vm0, %v413_v4 }
 0x118   : > { %v414_v5 = vpop.trf.xlu0 }
 0x119   : > { %993 = vmatmul.mubr.msk.bf16.vlgmr.msra.gmra.mxu0 %vm427_vm0, %v414_v5 }
 0x11c   : > { %v415_v6 = vpop.trf.xlu0 }
 0x11d   : > { %996 = vmatprep.mubr.msk.bf16.mxu0 %vm427_vm0, %v415_v6 }
 0x120   : > { %v416_v7 = vpop.trf.xlu0 }
 0x121   : > { %997 = vmatmul.mubr.msk.bf16.gmra.mxu0 %vm427_vm0, %v416_v7 }
 0x124   : > { %v417_v8 = vpop.trf.xlu0 }
 0x125   : > { %1000 = vmatprep.mubr.msk.bf16.mxu0 %vm427_vm0, %v417_v8 }
 0x128   : > { %v418_v9 = vpop.trf.xlu0 }
 0x129   : > { %1001 = vmatmul.mubr.msk.bf16.gmra.mxu0 %vm427_vm0, %v418_v9 }
 0x12c   : > { %v419_v10 = vpop.trf.xlu0 }
 0x12d   : > { %1004 = vmatprep.mubr.msk.bf16.mxu0 %vm427_vm0, %v419_v10 }
 0x130   : > { %v420_v11 = vpop.trf.xlu0 }
 0x131   : > { %1005 = vmatmul.mubr.msk.bf16.gmra.mxu0 %vm427_vm0, %v420_v11 }
 0x1d9   : > { %v994_v13 = vpop.f32.mrf.mxu0 }
 0x1db   : > { %v486_v14 = vpop.f32.mrf.mxu0 }
 0x1dd   : > { %v995_v15 = vpop.f32.mrf.mxu0 }
 0x1df   : > { %v489_v16 = vpop.f32.mrf.mxu0 }
 0x1e1   : > { %v1858_v17 = vpop.f32.mrf.mxu0 }
 0x1e2   : > { %v552_v28 = vmax.f32 %v994_v13, %v1858_v17 }
 0x1e3   : > { %v502_v18 = vpop.f32.mrf.mxu0 }
 0x1e4   : > { %v550_v29 = vmax.f32 %v486_v14, %v502_v18 }
 0x1e5   : > { %v1860_v19 = vpop.f32.mrf.mxu0 }
 0x1e6   : > { %v553_v26 = vmax.f32 %v995_v15, %v1860_v19 }
 0x1e7   : > { %v505_v20 = vpop.f32.mrf.mxu0 }
 0x1e8   : > { %v551_v30 = vmax.f32 %v489_v16, %v505_v20 }
 0x1e9   : > { %v1862_v21 = vpop.f32.mrf.mxu0 }
 0x1ea   : > { %v556_v33 = vmax.f32 %v552_v28, %v1862_v21 }
 0x1eb   : > { %v1864_v22 = vpop.f32.mrf.mxu0 }
 0x1ec   : > { %v554_v34 = vmax.f32 %v550_v29, %v1864_v22 }
 0x1ed   : > { %v1866_v23 = vpop.f32.mrf.mxu0 }
 0x1ee   : > { %v557_v31 = vmax.f32 %v553_v26, %v1866_v23 }
 0x1ef   : > { %v1868_v24 = vpop.f32.mrf.mxu0 }
 0x1f0   : > { %v555_v35 = vmax.f32 %v551_v30, %v1868_v24 }
 0x1f1   : > { %v1870_v25 = vpop.f32.mrf.mxu0 }
 0x1f2   : > { %v560_v38 = vmax.f32 %v556_v33, %v1870_v25 }
 0x1f3   : > { %v1873_v27 = vpop.f32.mrf.mxu0 }
 0x1f4   : > { %v558_v39 = vmax.f32 %v554_v34, %v1873_v27 }
 0x1f5   : > { %v1877_v32 = vpop.f32.mrf.mxu0 }
 0x1f6   : > { %v561_v36 = vmax.f32 %v557_v31, %v1877_v32 }
 0x1f7   : > { %v1883_v37 = vpop.f32.mrf.mxu0 }
 0x1f8   : > { %v559_v40 = vmax.f32 %v555_v35, %v1883_v37  ;;  %v563_v41 = vmax.f32 %v560_v38, %v561_v36 }
 0x1fa   : > { %v562_v42 = vmax.f32 %v558_v39, %v559_v40 }
 0x1fc   : > { %v564_v43 = vmax.f32 %v562_v42, %v563_v41 }
 0x1fe   : > { %v565_v44 = vrot.slane %v564_v43, 4 }
 0x200   : > { %v566_v45 = vmax.f32 %v564_v43, %v565_v44 }
 0x202   : > { %v567_v47 = vrot.slane %v566_v45, 2 }
 0x204   : > { %v568_v48 = vmax.f32 %v566_v45, %v567_v47 }
 0x206   : > { %v569_v50 = vrot.slane %v568_v48, 1 }
 0x208   : > { %v570_v52 = vmax.f32 %v568_v48, %v569_v50 }
 0x20a   : > { %v571_v54 = vmax.f32 %v549_v51, %v570_v52 }
 0x20c   : > { %v572_v55 = vsub.f32 %v549_v51, %v571_v54  ;;  %v579_v56 = vrot.slane %v571_v54, %v1888_v53  ;;  %713 = vst [vmem:[#allocation2] sm:$0x1] %v571_v54 }
 0x20e   : > { %v573_v57 = vmul.f32 1.442695, %v572_v55  ;;  %v581_v58 = vsub.f32 %v486_v14, %v579_v56  ;;  %v582_v59 = vsub.f32 %v489_v16, %v579_v56  ;;  %v583_v60 = vsub.f32 %v994_v13, %v579_v56 }
 0x20f   : > { %v584_v61 = vsub.f32 %v995_v15, %v579_v56  ;;  %v585_v0 = vsub.f32 %v502_v18, %v579_v56  ;;  %v586_v2 = vsub.f32 %v505_v20, %v579_v56  ;;  %v587_v4 = vsub.f32 %v1858_v17, %v579_v56 }
 0x210   : > { %1187 = vpow2.f32 %v573_v57  ;;  %v597_v62 = vmul.f32 1.442695, %v581_v58  ;;  %v599_v63 = vmul.f32 1.442695, %v582_v59  ;;  %v601_v1 = vmul.f32 1.442695, %v583_v60 }
 0x211   : > { %v603_v3 = vmul.f32 1.442695, %v584_v61  ;;  %v588_v5 = vsub.f32 %v1860_v19, %v579_v56  ;;  %v605_v6 = vmul.f32 1.442695, %v585_v0  ;;  %v589_v7 = vsub.f32 %v1864_v22, %v579_v56 }
 0x212   : > { %1189 = vpow2.f32 %v597_v62  ;;  %v590_v8 = vsub.f32 %v1868_v24, %v579_v56  ;;  %v607_v9 = vmul.f32 1.442695, %v586_v2  ;;  %v609_v10 = vmul.f32 1.442695, %v587_v4 }
 0x213   : > { %1191 = vpow2.f32 %v599_v63  ;;  %v595_v11 = vsub.f32 %v1870_v25, %v579_v56  ;;  %v611_v13 = vmul.f32 1.442695, %v588_v5  ;;  %v596_v14 = vsub.f32 %v1877_v32, %v579_v56 }
 0x214   : > { %1193 = vpow2.f32 %v601_v1  ;;  %v593_v15 = vsub.f32 %v1873_v27, %v579_v56  ;;  %v613_v16 = vmul.f32 1.442695, %v589_v7  ;;  %v594_v18 = vsub.f32 %v1883_v37, %v579_v56  ;;  %v629_v7 = vld [vmem:[#allocation3] sm:$0x1] }
 0x215   : > { %1195 = vpow2.f32 %v603_v3  ;;  %v615_v19 = vmul.f32 1.442695, %v590_v8  ;;  %v625_v20 = vmul.f32 1.442695, %v595_v11  ;;  %v591_v24 = vsub.f32 %v1862_v21, %v579_v56 }
 0x216   : > { %1197 = vpow2.f32 %v605_v6  ;;  %v627_v25 = vmul.f32 1.442695, %v596_v14  ;;  %v621_v26 = vmul.f32 1.442695, %v593_v15  ;;  %v592_v27 = vsub.f32 %v1866_v23, %v579_v56  ;;  %v662_v15 = vld [vmem:[%s338_s11] sm:$0xf] }
 0x217   : > { %1199 = vpow2.f32 %v607_v9  ;;  %v623_v29 = vmul.f32 1.442695, %v594_v18  ;;  %v617_v31 = vmul.f32 1.442695, %v591_v24 }
 0x218   : > { %1201 = vpow2.f32 %v609_v10  ;;  %v619_v21 = vmul.f32 1.442695, %v592_v27 }
 0x219   : > { %1203 = vpow2.f32 %v611_v13 }
 0x21a   : > { %1205 = vpow2.f32 %v613_v16  ;;  %v654_v16 = vld [vmem:[#allocation4] sm:$0xff] }
 0x21b   : > { %1207 = vpow2.f32 %v615_v19 }
 0x21c   : > { %1209 = vpow2.f32 %v625_v20 }
 0x21d   : > { %v1898_v17 = vpop.eup %1187  ;;  %1211 = vpow2.f32 %v627_v25 }
 0x21e   : > { %v659_v22 = vrot.slane %v1898_v17, %v1888_v53  ;;  %1213 = vpow2.f32 %v621_v26  ;;  %v630_v10 = vmul.f32 %v1898_v17, %v629_v7 }
 0x21f   : > { %v1904_v28 = vpop.eup %1189  ;;  %1215 = vpow2.f32 %v623_v29 }
 0x220   : > { %v1907_v30 = vpop.eup %1191  ;;  %1217 = vpow2.f32 %v617_v31  ;;  %v661_v18 = vmul.f32 %v659_v22, %v654_v16 }
 0x221   : > { %v631_v32 = vadd.f32 %v1907_v30, %v1904_v28  ;;  %v1194_v33 = vpop.eup %1193  ;;  %1219 = vpow2.f32 %v619_v21  ;;  %v663_v14 = vpack.c.bf16 %v1907_v30, %v1904_v28 }
 0x222   : > { %v1196_v35 = vpop.eup %1195 }
 0x223   : > { %v632_v34 = vadd.f32 %v1194_v33, %v631_v32  ;;  %v1198_v37 = vpop.eup %1197  ;;  %v664_v9 = vpack.c.bf16 %v1196_v35, %v1194_v33 }
 0x224   : > { %v1200_v38 = vpop.eup %1199 }
 0x225   : > { %v633_v36 = vadd.f32 %v1196_v35, %v632_v34  ;;  %v1202_v39 = vpop.eup %1201  ;;  %v665_v5 = vpack.c.bf16 %v1200_v38, %v1198_v37 }
 0x226   : > { %v1204_v41 = vpop.eup %1203 }
 0x227   : > { %v634_v23 = vadd.f32 %v1198_v37, %v633_v36  ;;  %v1206_v42 = vpop.eup %1205  ;;  %v666_v2 = vpack.c.bf16 %v1204_v41, %v1202_v39 }
 0x228   : > { %v1208_v44 = vpop.eup %1207 }
 0x229   : > { %v635_v40 = vadd.f32 %v1200_v38, %v634_v23  ;;  %v1210_v45 = vpop.eup %1209  ;;  %v667_v63 = vpack.c.bf16 %v1208_v44, %v1206_v42 }
 0x22a   : > { %v1212_v47 = vpop.eup %1211 }
 0x22b   : > { %v636_v43 = vadd.f32 %v1202_v39, %v635_v40  ;;  %v1214_v48 = vpop.eup %1213  ;;  %v670_v50 = vpack.c.bf16 %v1212_v47, %v1210_v45 }
 0x22c   : > { %v1216_v51 = vpop.eup %1215 }
 0x22d   : > { %v637_v46 = vadd.f32 %v1204_v41, %v636_v43  ;;  %1009 = vmatpush3.bf16.msra.mxu1 %v670_v50  ;;  %v1218_v54 = vpop.eup %1217  ;;  %v669_v56 = vpack.c.bf16 %v1216_v51, %v1214_v48 }
 0x22e   : > { %1010 = vmatprep.subr.bf16.mxu1 %v1506_v12  ;;  %v1220_v57 = vpop.eup %1219 }
 0x22f   : > { %v638_v49 = vadd.f32 %v1206_v42, %v637_v46  ;;  %v668_v60 = vpack.c.bf16 %v1220_v57, %v1218_v54 }
 0x231   : > { %v639_v52 = vadd.f32 %v1208_v44, %v638_v49  ;;  %1011 = vmatpush3.bf16.msra.mxu1 %v669_v56 }
 0x232   : > { %1012 = vmatprep.subr.bf16.mxu1 %v1506_v12 }
 0x233   : > { %v640_v55 = vadd.f32 %v1218_v54, %v639_v52 }
 0x235   : > { %v641_v58 = vadd.f32 %v1220_v57, %v640_v55  ;;  %1013 = vmatpush3.bf16.msra.mxu1 %v668_v60 }
 0x236   : > { %1014 = vmatprep.subr.bf16.mxu1 %v1506_v12 }
 0x237   : > { %v642_v59 = vadd.f32 %v1214_v48, %v641_v58 }
 0x239   : > { %v643_v61 = vadd.f32 %v1216_v51, %v642_v59  ;;  %1015 = vmatpush3.bf16.msra.mxu1 %v667_v63 }
 0x23a   : > { %1016 = vmatprep.subr.bf16.mxu1 %v1506_v12 }
 0x23b   : > { %v644_v62 = vadd.f32 %v1210_v45, %v643_v61 }
 0x23d   : > { %v645_v0 = vadd.f32 %v1212_v47, %v644_v62  ;;  %1017 = vmatpush3.bf16.msra.mxu1 %v666_v2 }
 0x23e   : > { %1018 = vmatprep.subr.bf16.mxu1 %v1506_v12 }
 0x23f   : > { %v646_v1 = vrot.slane %v645_v0, 4 }
 0x241   : > { %v647_v3 = vadd.f32 %v646_v1, %v645_v0  ;;  %1019 = vmatpush3.bf16.msra.mxu1 %v665_v5 }
 0x242   : > { %1020 = vmatprep.subr.bf16.mxu1 %v1506_v12 }
 0x243   : > { %v648_v4 = vrot.slane %v647_v3, 2 }
 0x245   : > { %v649_v6 = vadd.f32 %v648_v4, %v647_v3  ;;  %1021 = vmatpush3.bf16.msra.mxu1 %v664_v9 }
 0x246   : > { %1022 = vmatprep.subr.bf16.mxu1 %v1506_v12 }
 0x247   : > { %v650_v8 = vrot.slane %v649_v6, 1 }
 0x249   : > { %v651_v11 = vadd.f32 %v650_v8, %v649_v6  ;;  %1023 = vmatpush3.bf16.msra.mxu1 %v663_v14 }
 0x24b   : > { %v652_v13 = vadd.f32 %v651_v11, %v630_v10 }
 0x24c   : > { %1025 = vmatmul.mubr.bf16.vlgmr.msra.gmra.mxu1 %v662_v15 }
 0x24d   : > { %653 = vst [vmem:[#allocation3] sm:$0x1] %v652_v13 }
 0x30c   : > { %v705_v19 = vpop.f32.mrf.mxu1 }
 0x30d   : > { %v711_v20 = vadd.f32 %v705_v19, %v661_v18 }
 0x30e   : > { %v1026_v24 = vpop.f32.mrf.mxu1  ;;  %717 = sbr.rel (%p965_p7) target bundleno = 809 (0x329), region = 60 }
 0x30f   : > { %712 = vst [vmem:[#allocation4] sm:$0xff] %v711_v20 }
 0x310   : > { %v708_v25 = vpop.f32.mrf.mxu1 }
 0x312   : > { %v1027_v12 = vpop.f32.mrf.mxu1 }
 0x313   : > { %v718_v26 = vld [vmem:[#allocation3] sm:$0x1] }
 0x314   : > { %1221 = vrcp.f32 %v718_v26  ;;  %v728_v17 = vld [vmem:[%s347_s21] sm:$0xff] }
 0x316   : > { %v720_v27 = vld [vmem:[#allocation4] sm:$0xff] }
 0x321   : > { %v1222_v28 = vpop.eup %1221 }
 0x322   : > { %v725_v29 = vrot.slane %v1222_v28, %v1888_v53 }
 0x324   : > { %v727_v22 = vmul.f32 %v725_v29, %v720_v27 }
 0x326   : > { %v729_v30 = vadd.f32 %v728_v17, %v727_v22 }
 0x328   : > { %730 = vst [vmem:[%s386_s26] sm:$0xff] %v729_v30 }
 0x329 PF: > { %s2100_s10 = sld [smem:[#allocation23_spill]]  ;;  %s749_s16 = sshll.u32 %s386_s26, 4  ;;  %s750_s16 = int_to_ptr.vmem [resolvable:$true] %s749_s16 }
 0x32a   : > { %s2101_s13 = sld [smem:[#allocation22_spill]]  ;;  %s732_s11 = scalar_lea.sflag [#allocation7], %s1820_s3 }
 0x32b   : > { %s2102_s7 = sld [smem:[#allocation24_spill]]  ;;  %s1335_s4 = scalar_lea.vmem %s750_s16, 128 }
 0x32c   : > { %s2103_s18 = sld [smem:[#allocation32_spill]]  ;;  %p1336_p10 = scmp.ne.s32.totalorder %s750_s16, %s1335_s4 }
 0x32d   : > { %s2104_s15 = sld [smem:[#allocation40_spill]]  ;;  %s1508_s21 = smov [#allocation13]  }
 0x32e   : > { %s1339_s12 = sshll.u32 %s1508_s21, 4  ;;  %s1340_s12 = int_to_ptr.vmem [resolvable:$false] %s1339_s12 }
 0x32f   : > { %s967_s19 = sshll.u32 %s2100_s10, 1  ;;  %s1341_s5 = scalar_lea.vmem %s1340_s12, 256 }
 0x330   : > { %s743_s0 = sadd.s32 %s2101_s13, %s967_s19  ;;  %p1342_p13 = scmp.lt.s32.totalorder %s750_s16, %s1340_s12 }
 0x331   : > { %s968_s1 = sshll.u32 %s2102_s7, 2  ;;  %p1343_p11 = scmp.lt.s32.totalorder %s1341_s5, %s1335_s4 }
 0x332   : > { %s745_s8 = sadd.s32 %s968_s1, %s743_s0  ;;  %p2106_p1 = scmp.ne.s32.totalorder %s2103_s18, 0 }
 0x333   : > { %s969_s24 = sshll.u32 %s745_s8, 7  ;;  %s2105_s14 = smov %s2104_s15 }
 0x334   : > { %s747_s30 = scalar_lea.hbm %s2104_s15, %s969_s24  ;;  %p1337_p5 = pnand %p1336_p10, %p2106_p1 }
 0x335   : > { %p1344_p4 = por %p1343_p11, %p1342_p13 }
 0x336   : > { %p1338_p0 = pneg %p1337_p5 }
 0x338   : > { %p1345_p12 = pnand %p1344_p4, %p1338_p0 }
 0x33a   : > { %1348 = shalt.err (!%p1345_p12)
}
 0x33b   : > { %s1349_s22 = scalar_lea.hbm %s747_s30, 128  ;;  %s1353_s10 = scalar_lea.hbm %s2105_s14, 1024 }
 0x33c   : > { %p1350_p8 = scmp.ne.s32.totalorder %s747_s30, %s1349_s22  ;;  %p1354_p3 = scmp.lt.s32.totalorder %s747_s30, %s2105_s14 }
 0x33d   : > { %p1355_p2 = scmp.lt.s32.totalorder %s1353_s10, %s1349_s22 }
 0x33e   : > { %p1351_p9 = pnand %p1350_p8, %p2106_p1 }
 0x33f   : > { %p1356_p7 = por %p1355_p2, %p1354_p3 }
 0x340   : > { %p1352_p6 = pneg %p1351_p9 }
 0x342   : > { %p1357_p10 = pnand %p1356_p7, %p1352_p6 }
 0x344   : > { %1360 = shalt.err (!%p1357_p10)
}
 0x345   : > { %1036 = dma.vmem_to_hbm [thread:$0]  (%p2106_p1), %s750_s16, 128, %s747_s30, %s732_s11  }
 0x346 PF: > { %s2107_s19 = sld [smem:[#allocation19_spill]]  ;;  %p1056_p5 = scmp.ge.s32.totalorder %s1495_s29, 2 }
 0x347   : > { %s2108_s0 = sld [smem:[#allocation34_spill]] }
 0x34c   : > { %s761_s1 = sand.u32 1, %s2107_s19  }
 0x34d   : > { %p2109_p0 = scmp.ne.s32.totalorder %s2108_s0, 0  ;;  %s762_s8 = scalar_lea.sflag [#allocation7], %s761_s1 }
 0x34f   : > { %p1052_p13 = pnand %p1056_p5, %p2109_p0 }
 0x351   : > { %p1053_p11 = pneg %p1052_p13 }
 0x353   : > { %1434 = dma.done.wait (%p1053_p11), %s762_s8, 128  }
 0x354   : > { %1436 = vsyncadd (%p1053_p11), %s762_s8, 4294967168  ;;  %s26_s29 = sadd.s32 1, %s1495_s29   ;;  %s2111_s15 = sld [smem:[#allocation18_spill]] }
 0x355   : > { %p1958_p4 = scmp.ge.s32.totalorder %s26_s29, 18   ;;  %s2112_s18 = sld [smem:[#allocation20_spill]] }
 0x356   : > { %s2113_s6 = sld [smem:[#allocation36_spill]]  ;;  %s2120_s16 = smov %s1447_s17 }
 0x357   : > { %s2114_s22 = sld [smem:[#allocation25_spill]]  ;;  %s2121_s17 = smov %s1777_s9 }
 0x358   : > { %s2115_s30 = sld [smem:[#allocation27_spill]]  ;;  %s2122_s19 = smov %s1459_s20 }
 0x359   : > { %s2116_s26 = sld [smem:[#allocation30_spill]]  ;;  %s2124_s21 = smov %s1479_s25 }
 0x35a   : > { %s2117_s11 = sld [smem:[#allocation33_spill]]  ;;  %s2125_s23 = smov %s1487_s27 }
 0x35b   : > { %s2118_s4 = sld [smem:[#allocation35_spill]]  ;;  %s2126_s24 = smov %s1491_s28 }
 0x35c   : > { %s2123_s20 = smov %s2113_s6 }
 0x35d   :  { %25 = sbr.rel (!%p1958_p4) target bundleno = 20 (0x14), region = 126 }
 0x35e   : > { %s2127_s25 = smov %s2115_s30 }
 0x360   : > { %s2128_s27 = smov %s2117_s11 }
 0x361   : > { %s2129_s28 = smov %s2118_s4 }
 0x362   :  { %767 = vsyncpa [#allocation6], 1 }
 0x363   :  { %769 = vsyncpa [#allocation6 + $0x1], 1 }
 0x364   :  { %770 = vsyncpa [#allocation9], 1 }
 0x365   :  { %772 = vsyncpa [#allocation9 + $0x1], 1 }
 0x366   :  { %773 = vsyncpa [#allocation12], 1 }
 0x367   :  { %775 = vsyncpa [#allocation12 + $0x1], 1 }
 0x368   :  { %776 = vsyncpa [#allocation7], 1 }
 0x369   :  { %778 = vsyncpa [#allocation7 + $0x1], 1 }

</bundles_post_ra>
